<compile_context>
chip_gen: v7x
topology: tpu7x:2x2x1
jax: 0.10.0
libtpu: 0.0.40
codegen_flags: <defaults>
</compile_context>

<pallas_src>
import jax
import jax.numpy as jnp
from jax.experimental import pallas as pl
from jax.experimental.pallas import tpu as pltpu

LANE = 128
MIB = 1024 * 1024


# --------------------------------------------------------------------------- #
# Kernels
# --------------------------------------------------------------------------- #
def mlp_kernel(x_ref, w1_ref, b1_ref, w2_ref, b2_ref, o_ref):
    """Fused x@W1 + b1 -> ReLU -> @W2 + b2, weights fully resident in VMEM."""
    h = jnp.dot(x_ref[...], w1_ref[...], preferred_element_type=jnp.float32)
    h = jnp.maximum(h + b1_ref[...], 0.0)      # bias + ReLU on the f32 accumulator
    h = h.astype(w2_ref.dtype)                 # narrow only for the 2nd MXU pass
    out = jnp.dot(h, w2_ref[...], preferred_element_type=jnp.float32) + b2_ref[...]
    o_ref[...] = out.astype(o_ref.dtype)


def mlp_kernel_hidden_tiled(x_ref, w1_ref, b1_ref, w2_ref, b2_ref, o_ref, acc_ref):
    """Same math, but the hidden dim is tiled over an 'arbitrary' grid axis and
    partial logits are accumulated in a f32 VMEM scratch (for weights that are
    too big to keep fully resident, e.g. under v7x's 64 MiB VMEM)."""
    k = pl.program_id(1)

    @pl.when(k == 0)
    def _():
        acc_ref[...] = jnp.zeros_like(acc_ref)

    h = jnp.dot(x_ref[...], w1_ref[...], preferred_element_type=jnp.float32)
    h = jnp.maximum(h + b1_ref[...], 0.0).astype(w2_ref.dtype)
    acc_ref[...] += jnp.dot(h, w2_ref[...], preferred_element_type=jnp.float32)

    @pl.when(k == pl.num_programs(1) - 1)
    def _():
        o_ref[...] = (acc_ref[...] + b2_ref[...]).astype(o_ref.dtype)


# --------------------------------------------------------------------------- #
# Helpers
# --------------------------------------------------------------------------- #
def _round_up(n, m):
    return ((n + m - 1) // m) * m


def _device_kind():
    try:
        return jax.devices()[0].device_kind.lower()
    except (RuntimeError, IndexError):
        return ""


def _vmem_capacity_bytes(kind):
    """Physical per-core VMEM, used to derive a generation-aware budget."""
    default = 64 * MIB if "v7" in kind else 128 * MIB   # v7x: 64 MiB; v5e/v6e: 128 MiB
    get_info = getattr(pltpu, "get_tpu_info", None)
    if get_info is None:
        return default
    try:
        info = get_info()
    except (RuntimeError, NotImplementedError, ValueError):
        return default
    return int(getattr(info, "vmem_capacity_bytes", default))


def _pad_contraction(n, prefer_256):
    """Pad a contraction dim to x128; on v6e/v7x (2x256^2 MXU) prefer x256 when
    the extra padding stays within ~25% of the raw size."""
    p = _round_up(n, LANE)
    if prefer_256 and p % 256 != 0:
        p256 = _round_up(n, 256)
        if p256 <= int(1.25 * n):
            p = p256
    return p


# --------------------------------------------------------------------------- #
# Forward wrapper
# --------------------------------------------------------------------------- #
def neural_net2_forward(x, w1, b1, w2, b2, *, batch_tile=1024,
                        compute_dtype=jnp.bfloat16, hidden_tile=None,
                        force_hidden_tiled=False):
    """x:(B,IN), w1:(IN,H), b1:(1,H), w2:(H,C), b2:(1,C) -> (B,C) logits (x.dtype)."""
    B, IN = x.shape
    H = w1.shape[1]
    C = w2.shape[1]
    out_dtype = x.dtype
    cbytes = jnp.dtype(compute_dtype).itemsize

    kind = _device_kind()
    prefer_256 = ("v6" in kind) or ("v7" in kind)   # 256-wide MXU contraction
    multi_core = "v7" in kind                       # 2 TensorCores per chip
    budget = int(0.8 * _vmem_capacity_bytes(kind))  # headroom for Mosaic scratch

    # --- padded problem sizes -------------------------------------------------
    INP = _pad_contraction(IN, prefer_256)          # dense lanes + full MXU K (1st mm)
    HP = _pad_contraction(H, prefer_256)            # dense hidden lanes / K (2nd mm)
    CP = _round_up(max(C, LANE), LANE)              # lane-dense output (unmasked vst)

    # Small-C outputs are write-back-bound at f32 x 128 lanes -> store bf16 and
    # cast back to out_dtype after slicing off the padded classes.
    store_dtype = jnp.bfloat16 if C < LANE else out_dtype
    sbytes = jnp.dtype(store_dtype).itemsize

    # --- batch / hidden tiling -------------------------------------------------
    sub = 16 if cbytes == 2 else 8                  # sublane multiple for batch dim
    tb = max(sub, (min(int(batch_tile), _round_up(B, sub)) // sub) * sub)

    def resident_need(tb_):
        return (2 * tb_ * INP * cbytes              # double-buffered x tiles
                + 2 * tb_ * CP * sbytes             # double-buffered out tiles
                + (INP * HP + HP * CP) * cbytes     # resident weights (single-buffered)
                + (HP + CP) * 4                     # f32 biases
                + tb_ * HP * (4 + cbytes))          # f32 + bf16 hidden intermediates

    while resident_need(tb) > budget and tb > sub:
        tb = max(sub, ((tb // 2) // sub) * sub)

    use_hidden_tiled = force_hidden_tiled or resident_need(tb) > budget

    th = LANE
    if use_hidden_tiled:
        th = min(HP, int(hidden_tile) if hidden_tile is not None else 4 * LANE)
        th = max(LANE, (th // LANE) * LANE)
        while HP % th != 0:                         # grid must divide HP exactly
            th -= LANE

        def tiled_need(tb_, th_):
            return (2 * tb_ * INP * cbytes
                    + 2 * tb_ * CP * sbytes
                    + 2 * ((INP * th_ + th_ * CP) * cbytes + th_ * 4) + CP * 4
                    + tb_ * CP * 4                  # f32 accumulator scratch
                    + tb_ * th_ * (4 + cbytes))

        while tiled_need(tb, th) > budget and tb > sub:
            tb = max(sub, ((tb // 2) // sub) * sub)
        while tiled_need(tb, th) > budget and th > LANE:
            th = max(LANE, ((th // 2) // LANE) * LANE)
            while HP % th != 0:
                th -= LANE
        need = tiled_need(tb, th)
    else:
        need = resident_need(tb)

    if multi_core:
        # v7x: make sure the 'parallel' batch axis has >=2 steps so both TCs work.
        while _round_up(B, tb) // tb < 2 and tb > sub:
            tb = max(sub, ((tb // 2) // sub) * sub)

    Bp = _round_up(B, tb)                           # pad batch so the grid divides
    vmem_limit = int(min(budget, max(32 * MIB, 2 * need)))

    # --- operand prep (cast + zero-pad once, outside the hot loop) -------------
    # Zero-padded b1 columns and W2 rows guarantee the padded hidden lanes are
    # exactly ReLU(0)=0 and contribute nothing to the logits.
    xp = jnp.zeros((Bp, INP), compute_dtype).at[:B, :IN].set(x.astype(compute_dtype))
    w1p = jnp.zeros((INP, HP), compute_dtype).at[:IN, :H].set(w1.astype(compute_dtype))
    b1p = jnp.zeros((1, HP), jnp.float32).at[:, :H].set(
        b1.reshape(1, H).astype(jnp.float32))
    w2p = jnp.zeros((HP, CP), compute_dtype).at[:H, :C].set(w2.astype(compute_dtype))
    b2p = jnp.zeros((1, CP), jnp.float32).at[:, :C].set(
        b2.reshape(1, C).astype(jnp.float32))

    cost = pl.CostEstimate(
        flops=2 * Bp * (INP * HP + HP * CP),
        transcendentals=0,
        bytes_accessed=(Bp * INP * cbytes + (INP * HP + HP * CP) * cbytes
                        + (HP + CP) * 4 + Bp * CP * sbytes),
    )

    if not use_hidden_tiled:
        grid = (Bp // tb,)

        def build(single_buffer_weights):
            def wspec(shape):
                if single_buffer_weights:
                    # Constant index map -> fetched once; single buffer frees VMEM.
                    return pl.BlockSpec(shape, lambda i: (0, 0),
                                        pipeline_mode=pl.Buffered(1))
                return pl.BlockSpec(shape, lambda i: (0, 0))

            return pl.pallas_call(
                mlp_kernel,
                out_shape=jax.ShapeDtypeStruct((Bp, CP), store_dtype),
                grid_spec=pltpu.PrefetchScalarGridSpec(
                    num_scalar_prefetch=0,
                    grid=grid,
                    in_specs=[
                        pl.BlockSpec((tb, INP), lambda i: (i, 0)),  # x streamed over batch
                        wspec((INP, HP)),                           # W1 (resident)
                        wspec((1, HP)),                             # b1
                        wspec((HP, CP)),                            # W2 (resident)
                        wspec((1, CP)),                             # b2
                    ],
                    out_specs=pl.BlockSpec((tb, CP), lambda i: (i, 0)),
                ),
                compiler_params=pltpu.CompilerParams(
                    dimension_semantics=("parallel",),  # megacore-shardable batch axis
                    vmem_limit_bytes=vmem_limit,
                ),
                cost_estimate=cost,
            )(xp, w1p, b1p, w2p, b2p)

        try:
            out_p = build(True)
        except (TypeError, ValueError, NotImplementedError, pltpu.LoweringException):
            # pl.Buffered(1) single-buffering rejected by this jax/Mosaic version;
            # fall back to default double-buffered weight specs (correctness
            # identical, only costs a second weight buffer in VMEM).
            out_p = build(False)
    else:
        grid = (Bp // tb, HP // th)
        out_p = pl.pallas_call(
            mlp_kernel_hidden_tiled,
            out_shape=jax.ShapeDtypeStruct((Bp, CP), store_dtype),
            grid_spec=pltpu.PrefetchScalarGridSpec(
                num_scalar_prefetch=0,
                grid=grid,
                in_specs=[
                    pl.BlockSpec((tb, INP), lambda i, k: (i, 0)),  # x resident across k
                    pl.BlockSpec((INP, th), lambda i, k: (0, k)),  # W1 column tile
                    pl.BlockSpec((1, th), lambda i, k: (0, k)),    # b1 tile
                    pl.BlockSpec((th, CP), lambda i, k: (k, 0)),   # W2 row tile
                    pl.BlockSpec((1, CP), lambda i, k: (0, 0)),    # b2
                ],
                out_specs=pl.BlockSpec((tb, CP), lambda i, k: (i, 0)),
                scratch_shapes=[pltpu.VMEM((tb, CP), jnp.float32)],
            ),
            compiler_params=pltpu.CompilerParams(
                dimension_semantics=("parallel", "arbitrary"),
                vmem_limit_bytes=vmem_limit,
            ),
            cost_estimate=cost,
        )(xp, w1p, b1p, w2p, b2p)

    return out_p[:B, :C].astype(out_dtype)


def init_params(key, input_size, hidden_size, num_classes, dtype=jnp.float32):
    # Deterministic init mirroring PyTorch nn.Linear default:
    # uniform(-1/sqrt(fan_in), 1/sqrt(fan_in)) for both weight and bias.
    k1, k2, k3, k4 = jax.random.split(key, 4)
    bound1 = 1.0 / jnp.sqrt(input_size)
    bound2 = 1.0 / jnp.sqrt(hidden_size)
    w1 = jax.random.uniform(k1, (input_size, hidden_size), dtype, -bound1, bound1)
    b1 = jax.random.uniform(k2, (1, hidden_size), dtype, -bound1, bound1)
    w2 = jax.random.uniform(k3, (hidden_size, num_classes), dtype, -bound2, bound2)
    b2 = jax.random.uniform(k4, (1, num_classes), dtype, -bound2, bound2)
    return w1, b1, w2, b2


if __name__ == "__main__":
    input_size, hidden_size, num_classes = 16, 32, 4
    batch = 8

    key = jax.random.PRNGKey(0)
    kx, kp, kp2 = jax.random.split(key, 3)
    x = jax.random.normal(kx, (batch, input_size), jnp.float32)
    w1, b1, w2, b2 = init_params(kp, input_size, hidden_size, num_classes)

    out = neural_net2_forward(x, w1, b1, w2, b2)
    out = jax.block_until_ready(out)
    assert out.shape == (batch, num_classes)
    assert out.dtype == x.dtype

    # Reference 1: same bf16 casts / f32 accumulation / bf16 logit store as the kernel.
    xb, w1b, w2b = (t.astype(jnp.bfloat16) for t in (x, w1, w2))
    h_ref = jnp.maximum(
        jnp.dot(xb, w1b, preferred_element_type=jnp.float32) + b1, 0.0)
    ref_bf16 = jnp.dot(h_ref.astype(jnp.bfloat16), w2b,
                       preferred_element_type=jnp.float32) + b2
    ref_bf16_store = ref_bf16.astype(jnp.bfloat16).astype(jnp.float32)
    assert jnp.allclose(out, ref_bf16_store, atol=2e-3, rtol=2e-2)

    # Reference 2: original f32 module semantics (loose tol for bf16 compute).
    ref_f32 = jnp.maximum(x @ w1 + b1, 0.0) @ w2 + b2
    assert jnp.allclose(out, ref_f32, atol=5e-2, rtol=5e-2)

    # Exercise the hidden-dim-tiled (weights-don't-fit) fallback path as well.
    out_tiled = jax.block_until_ready(
        neural_net2_forward(x, w1, b1, w2, b2, force_hidden_tiled=True))
    assert jnp.allclose(out_tiled, ref_f32, atol=5e-2, rtol=5e-2)

    # And a multi-step hidden-tiled accumulation (3 k-steps at hidden=384, th=128).
    w1L, b1L, w2L, b2L = init_params(kp2, input_size, 384, num_classes)
    out_L = jax.block_until_ready(
        neural_net2_forward(x, w1L, b1L, w2L, b2L,
                            force_hidden_tiled=True, hidden_tile=128))
    ref_L = jnp.maximum(x @ w1L + b1L, 0.0) @ w2L + b2L
    assert out_L.shape == (batch, num_classes)
    assert jnp.allclose(out_L, ref_L, atol=5e-2, rtol=5e-2)

    print("KERNEL_OK")
</pallas_src>

<mosaic_0001>
module attributes {stable_mosaic.version = 11 : i64} {
  func.func @mlp_kernel(%arg0: i32, %arg1: memref<16x128xbf16, #tpu.memory_space<vmem>>, %arg2: memref<128x128xbf16, #tpu.memory_space<vmem>>, %arg3: memref<1x128xf32, #tpu.memory_space<vmem>>, %arg4: memref<128x128xbf16, #tpu.memory_space<vmem>>, %arg5: memref<1x128xf32, #tpu.memory_space<vmem>>, %arg6: memref<16x128xbf16, #tpu.memory_space<vmem>>) attributes {dimension_semantics = [#tpu.dimension_semantics<parallel>], iteration_bounds = array<i64: 1>, scalar_prefetch = 0 : i64, scratch_operands = 0 : i64, tpu.core_type = #tpu.core_type<tc>, window_params = [{transform_indices = @transform_0, window_bounds = array<i64: 16, 128>}, {pipeline_mode = #tpu.pipeline_mode<synchronous>, transform_indices = @transform_1, window_bounds = array<i64: 128, 128>}, {pipeline_mode = #tpu.pipeline_mode<synchronous>, transform_indices = @transform_2, window_bounds = array<i64: 1, 128>}, {pipeline_mode = #tpu.pipeline_mode<synchronous>, transform_indices = @transform_3, window_bounds = array<i64: 128, 128>}, {pipeline_mode = #tpu.pipeline_mode<synchronous>, transform_indices = @transform_4, window_bounds = array<i64: 1, 128>}, {transform_indices = @transform_5, window_bounds = array<i64: 16, 128>}]} {
    %c0 = arith.constant 0 : index
    %c0_0 = arith.constant 0 : index
    %0 = vector.load %arg1[%c0, %c0_0] : memref<16x128xbf16, #tpu.memory_space<vmem>>, vector<16x128xbf16>
    %c0_1 = arith.constant 0 : index
    %c0_2 = arith.constant 0 : index
    %1 = vector.load %arg2[%c0_1, %c0_2] : memref<128x128xbf16, #tpu.memory_space<vmem>>, vector<128x128xbf16>
    %cst = arith.constant dense<0.000000e+00> : vector<16x128xf32>
    %2 = tpu.matmul %0, %1, %cst {dimension_numbers = #tpu.dot_dimension_numbers<[1], [0], [0], [1], [0, 0, 1, 1], [], []>} : vector<16x128xbf16>, vector<128x128xbf16>, vector<16x128xf32> -> vector<16x128xf32>
    %c0_3 = arith.constant 0 : index
    %c0_4 = arith.constant 0 : index
    %3 = vector.load %arg3[%c0_3, %c0_4] : memref<1x128xf32, #tpu.memory_space<vmem>>, vector<1x128xf32>
    %4 = vector.broadcast %3 : vector<1x128xf32> to vector<16x128xf32>
    %5 = arith.addf %2, %4 : vector<16x128xf32>
    %cst_5 = arith.constant 0.000000e+00 : f32
    %6 = vector.broadcast %cst_5 : f32 to vector<16x128xf32>
    %7 = arith.maximumf %5, %6 : vector<16x128xf32>
    %8 = arith.truncf %7 : vector<16x128xf32> to vector<16x128xbf16>
    %c0_6 = arith.constant 0 : index
    %c0_7 = arith.constant 0 : index
    %9 = vector.load %arg4[%c0_6, %c0_7] : memref<128x128xbf16, #tpu.memory_space<vmem>>, vector<128x128xbf16>
    %cst_8 = arith.constant dense<0.000000e+00> : vector<16x128xf32>
    %10 = tpu.matmul %8, %9, %cst_8 {dimension_numbers = #tpu.dot_dimension_numbers<[1], [0], [0], [1], [0, 0, 1, 1], [], []>} : vector<16x128xbf16>, vector<128x128xbf16>, vector<16x128xf32> -> vector<16x128xf32>
    %c0_9 = arith.constant 0 : index
    %c0_10 = arith.constant 0 : index
    %11 = vector.load %arg5[%c0_9, %c0_10] : memref<1x128xf32, #tpu.memory_space<vmem>>, vector<1x128xf32>
    %12 = vector.broadcast %11 : vector<1x128xf32> to vector<16x128xf32>
    %13 = arith.addf %10, %12 : vector<16x128xf32>
    %14 = arith.truncf %13 : vector<16x128xf32> to vector<16x128xbf16>
    %c0_11 = arith.constant 0 : index
    %c0_12 = arith.constant 0 : index
    %15 = vector.load %arg6[%c0_11, %c0_12] : memref<16x128xbf16, #tpu.memory_space<vmem>>, vector<16x128xbf16>
    tpu.vector_store %arg6[%c0_11, %c0_12], %14 {strides = array<i32>} : memref<16x128xbf16, #tpu.memory_space<vmem>>, vector<16x128xbf16>,
    return
  }
  func.func @transform_0(%arg0: i32) -> (i32, i32) {
    %c0_i32 = arith.constant 0 : i32
    %c0_i32_0 = arith.constant 0 : i32
    return %arg0, %c0_i32 : i32, i32
  }
  func.func @transform_1(%arg0: i32) -> (i32, i32) {
    %c0_i32 = arith.constant 0 : i32
    %c0_i32_0 = arith.constant 0 : i32
    %c0_i32_1 = arith.constant 0 : i32
    return %c0_i32, %c0_i32_0 : i32, i32
  }
  func.func @transform_2(%arg0: i32) -> (i32, i32) {
    %c0_i32 = arith.constant 0 : i32
    %c0_i32_0 = arith.constant 0 : i32
    %c0_i32_1 = arith.constant 0 : i32
    return %c0_i32, %c0_i32_0 : i32, i32
  }
  func.func @transform_3(%arg0: i32) -> (i32, i32) {
    %c0_i32 = arith.constant 0 : i32
    %c0_i32_0 = arith.constant 0 : i32
    %c0_i32_1 = arith.constant 0 : i32
    return %c0_i32, %c0_i32_0 : i32, i32
  }
  func.func @transform_4(%arg0: i32) -> (i32, i32) {
    %c0_i32 = arith.constant 0 : i32
    %c0_i32_0 = arith.constant 0 : i32
    %c0_i32_1 = arith.constant 0 : i32
    return %c0_i32, %c0_i32_0 : i32, i32
  }
  func.func @transform_5(%arg0: i32) -> (i32, i32) {
    %c0_i32 = arith.constant 0 : i32
    %c0_i32_0 = arith.constant 0 : i32
    return %arg0, %c0_i32 : i32, i32
  }
}

</mosaic_0001>

<bundles_post_ra>
// kernel: tpu_custom_call.1
= control target key start
LH: loop header
LB: loop body
LE: loop exit
PB: predicated region body
PF: predicated region fallthrough
CT: control target
= control target key end

     0   :  { %10 = vsyncpa [#allocation3], 0  ;;  %s642_s0 = inlined_call_operand.hbm [shape: bf16[16,128], index: 0, kind: input, shape index: {}]   ;;  %s643_s1 = inlined_call_operand.hbm [shape: bf16[128,128], index: 1, kind: input, shape index: {}]   ;;  %s644_s2 = inlined_call_operand.vmem [shape: f32[1,128], index: 2, kind: input, shape index: {}]   ;;  %s645_s3 = inlined_call_operand.hbm [shape: bf16[128,128], index: 3, kind: input, shape index: {}]   ;;  %s646_s4 = inlined_call_operand.vmem [shape: f32[1,128], index: 4, kind: input, shape index: {}]   ;;  %s647_s5 = inlined_call_operand.hbm [shape: bf16[16,128], index: 5, kind: output, shape index: {}]  }
   0x1   :  { %11 = vsyncpa [#allocation6], 0 }
   0x2   :  { %12 = vsyncpa [#allocation4], 0  ;;  %s531_s18 = smov [#allocation5]   ;;  %s532_s20 = smov [#allocation2]  }
   0x3   :  { %s30_s19 = sshll.u32 %s531_s18, 4  ;;  %s18_s21 = sshll.u32 %s532_s20, 4  ;;  %s31_s19 = int_to_ptr.vmem [resolvable:$true] %s30_s19  ;;  %s569_s21 = int_to_ptr.vmem [resolvable:$true] %s18_s21 }
   0x4   :  { %s437_s24 = scalar_lea.hbm %s643_s1, 1024 }
   0x5   :  { %p438_p0 = scmp.ne.s32.totalorder %s643_s1, %s437_s24  ;;  %p441_p1 = scmp.lt.u32.totalorder %s437_s24, %s643_s1 }
   0x7   :  { %p443_p2 = pnand %p441_p1, %p438_p0 }
   0x9   :  { %446 = shalt.err (!%p443_p2)
}
   0xa   :  { %s447_s29 = scalar_lea.vmem %s31_s19, 1024  ;;  %p452_p4 = scmp.lt.s32.totalorder %s31_s19, %s31_s19 }
   0xb   :  { %p448_p3 = scmp.ne.s32.totalorder %s31_s19, %s447_s29  ;;  %p453_p5 = scmp.lt.s32.totalorder %s447_s29, %s447_s29 }
   0xd   :  { %p454_p6 = por %p453_p5, %p452_p4 }
   0xf   :  { %p455_p7 = pnand %p454_p6, %p448_p3 }
  0x11   :  { %458 = shalt.err (!%p455_p7)
}
  0x12   :  { %s533_s30 = smov 64   ;;  %s534_s6 = smov 4  }
  0x13   :  { %36 = dma.hbm_to_vmem [thread:$0]  %s643_s1, 1024, %s31_s19, [#allocation6], %s533_s30, %s533_s30, %s534_s6  }
  0x14   :  { %s459_s11 = scalar_lea.hbm %s642_s0, 128 }
  0x15   :  { %p460_p8 = scmp.ne.s32.totalorder %s642_s0, %s459_s11  ;;  %p463_p9 = scmp.lt.u32.totalorder %s459_s11, %s642_s0 }
  0x17   :  { %p465_p10 = pnand %p463_p9, %p460_p8 }
  0x19   :  { %468 = shalt.err (!%p465_p10)
}
  0x1a   :  { %s469_s16 = scalar_lea.vmem %s569_s21, 128  ;;  %p474_p12 = scmp.lt.s32.totalorder %s569_s21, %s569_s21 }
  0x1b   :  { %p470_p11 = scmp.ne.s32.totalorder %s569_s21, %s469_s16  ;;  %p475_p13 = scmp.lt.s32.totalorder %s469_s16, %s469_s16 }
  0x1d   :  { %p476_p0 = por %p475_p13, %p474_p12 }
  0x1f   :  { %p477_p1 = pnand %p476_p0, %p470_p11 }
  0x21   :  { %480 = shalt.err (!%p477_p1)
}
  0x22   :  { %24 = dma.hbm_to_vmem [thread:$0]  %s642_s0, 128, %s569_s21, [#allocation3], %s533_s30, %s533_s30, %s534_s6  }
  0x23   :  { %s535_s18 = smov [#allocation7]   ;;  %s481_s23 = scalar_lea.hbm %s645_s3, 1024 }
  0x24   :  { %s44_s19 = sshll.u32 %s535_s18, 4  ;;  %p482_p2 = scmp.ne.s32.totalorder %s645_s3, %s481_s23  ;;  %s45_s19 = int_to_ptr.vmem [resolvable:$true] %s44_s19 }
  0x25   :  { %p485_p3 = scmp.lt.u32.totalorder %s481_s23, %s645_s3 }
  0x27   :  { %p487_p4 = pnand %p485_p3, %p482_p2 }
  0x29   :  { %490 = shalt.err (!%p487_p4)
}
  0x2a   :  { %s491_s28 = scalar_lea.vmem %s45_s19, 1024  ;;  %p496_p6 = scmp.lt.s32.totalorder %s45_s19, %s45_s19 }
  0x2b   :  { %p492_p5 = scmp.ne.s32.totalorder %s45_s19, %s491_s28  ;;  %p497_p7 = scmp.lt.s32.totalorder %s491_s28, %s491_s28 }
  0x2d   :  { %p498_p8 = por %p497_p7, %p496_p6 }
  0x2f   :  { %p499_p9 = pnand %p498_p8, %p492_p5 }
  0x31   :  { %502 = shalt.err (!%p499_p9)
}
  0x32   :  { %50 = dma.hbm_to_vmem [thread:$0]  %s645_s3, 1024, %s45_s19, [#allocation6], %s533_s30, %s533_s30, %s534_s6  }
  0x33   :  { %525 = dma.done.wait [#allocation3], 128  }
  0x34   :  { %526 = vsyncadd [#allocation3], 4294967168 }
  0x35   :  { %527 = dma.done.wait [#allocation6], 2048  }
  0x36   :  { %528 = vsyncadd [#allocation6], 4294965248  ;;  %v536_v0 = vmov 0.0   ;;  %vm537_vm0 = vmmov 0   ;;  %v420_v1 = vld [vmem:[#allocation5] sm:$0xff]   ;;  %v421_v2 = vld [vmem:[#allocation5 + $0x8] sm:$0xff]  }
  0x37   :  { %372 = vmatprep.subr.bf16.mxu0 %v536_v0  ;;  %388 = vmatprep.mubr.msk.bf16.mxu0 %vm537_vm0, %v536_v0  ;;  %v422_v3 = vld [vmem:[#allocation5 + $0x10] sm:$0xff]   ;;  %v429_v4 = vld [vmem:[#allocation7] sm:$0xff]   ;;  %v423_v5 = vld [vmem:[#allocation5 + $0x18] sm:$0xff]   ;;  %s538_s9 = smov [#allocation8]  }
  0x38   :  { %392 = vmatprep.subr.bf16.mxu1 %v536_v0  ;;  %408 = vmatprep.mubr.msk.bf16.mxu1 %vm537_vm0, %v536_v0  ;;  %v430_v6 = vld [vmem:[#allocation7 + $0x8] sm:$0xff]   ;;  %v424_v7 = vld [vmem:[#allocation5 + $0x20] sm:$0xff]   ;;  %v431_v8 = vld [vmem:[#allocation7 + $0x10] sm:$0xff]   ;;  %s313_s10 = sshll.u32 %s538_s9, 4  ;;  %s314_s10 = int_to_ptr.vmem [resolvable:$true] %s313_s10 }
  0x39   :  { %373 = vmatpush3.bf16.msra.mxu0 %v420_v1  ;;  %393 = vmatpush3.bf16.msra.mxu1 %v429_v4  ;;  %v425_v9 = vld [vmem:[#allocation5 + $0x28] sm:$0xff]   ;;  %v432_v10 = vld [vmem:[#allocation7 + $0x18] sm:$0xff]   ;;  %v426_v11 = vld [vmem:[#allocation5 + $0x30] sm:$0xff]   ;;  %p508_p11 = scmp.lt.s32.totalorder %s314_s10, %s314_s10 }
  0x3a   :  { %374 = vmatprep.subr.bf16.mxu0 %v536_v0  ;;  %394 = vmatprep.subr.bf16.mxu1 %v536_v0  ;;  %v433_v12 = vld [vmem:[#allocation7 + $0x20] sm:$0xff]   ;;  %v427_v13 = vld [vmem:[#allocation5 + $0x38] sm:$0xff]   ;;  %v434_v14 = vld [vmem:[#allocation7 + $0x28] sm:$0xff]  }
  0x3b   :  { %v428_v15 = vld [vmem:[#allocation2] sm:$0xff]   ;;  %v435_v16 = vld [vmem:[#allocation7 + $0x30] sm:$0xff]  }
  0x3c   :  { %v436_v17 = vld [vmem:[#allocation7 + $0x38] sm:$0xff]  }
  0x3d   :  { %375 = vmatpush3.bf16.msra.mxu0 %v421_v2  ;;  %395 = vmatpush3.bf16.msra.mxu1 %v430_v6  ;;  %v326_v18 = vld [vmem:[%s644_s2] ss:$0 sm:$0xff]  ;;  %s503_s2 = scalar_lea.vmem %s314_s10, 128 }
  0x3e   :  { %376 = vmatprep.subr.bf16.mxu0 %v536_v0  ;;  %396 = vmatprep.subr.bf16.mxu1 %v536_v0  ;;  %v336_v28 = vld [vmem:[%s646_s4] ss:$0 sm:$0xff]  ;;  %p504_p10 = scmp.ne.s32.totalorder %s314_s10, %s503_s2  ;;  %p509_p12 = scmp.lt.s32.totalorder %s503_s2, %s503_s2 }
  0x40   :  { %p510_p13 = por %p509_p12, %p508_p11 }
  0x41   :  { %377 = vmatpush3.bf16.msra.mxu0 %v422_v3  ;;  %397 = vmatpush3.bf16.msra.mxu1 %v431_v8 }
  0x42   :  { %378 = vmatprep.subr.bf16.mxu0 %v536_v0  ;;  %398 = vmatprep.subr.bf16.mxu1 %v536_v0  ;;  %p511_p0 = pnand %p510_p13, %p504_p10 }
  0x45   :  { %379 = vmatpush3.bf16.msra.mxu0 %v423_v5  ;;  %399 = vmatpush3.bf16.msra.mxu1 %v432_v10 }
  0x46   :  { %380 = vmatprep.subr.bf16.mxu0 %v536_v0  ;;  %400 = vmatprep.subr.bf16.mxu1 %v536_v0 }
  0x49   :  { %381 = vmatpush3.bf16.msra.mxu0 %v424_v7  ;;  %401 = vmatpush3.bf16.msra.mxu1 %v433_v12 }
  0x4a   :  { %382 = vmatprep.subr.bf16.mxu0 %v536_v0  ;;  %402 = vmatprep.subr.bf16.mxu1 %v536_v0 }
  0x4d   :  { %383 = vmatpush3.bf16.msra.mxu0 %v425_v9  ;;  %403 = vmatpush3.bf16.msra.mxu1 %v434_v14 }
  0x4e   :  { %384 = vmatprep.subr.bf16.mxu0 %v536_v0  ;;  %404 = vmatprep.subr.bf16.mxu1 %v536_v0 }
  0x51   :  { %385 = vmatpush3.bf16.msra.mxu0 %v426_v11  ;;  %405 = vmatpush3.bf16.msra.mxu1 %v435_v16 }
  0x52   :  { %386 = vmatprep.subr.bf16.mxu0 %v536_v0  ;;  %406 = vmatprep.subr.bf16.mxu1 %v536_v0 }
  0x55   :  { %387 = vmatpush3.bf16.msra.mxu0 %v427_v13  ;;  %407 = vmatpush3.bf16.msra.mxu1 %v436_v17 }
  0x58   :  { %389 = vmatmul.mubr.bf16.vlgmr.msra.gmra.mrb[0].mxu0 %v428_v15 }
 0x12b   :  { %v176_v19 = vpop.f32.mrb[0].mxu0 }
 0x12c   :  { %v177_v20 = vadd.f32 %v326_v18, %v176_v19  ;;  %v390_v21 = vpop.f32.mrb[1].mxu0 }
 0x12d   :  { %v179_v22 = vpop.f32.mrb[2].mxu0 }
 0x12e   :  { %v180_v23 = vadd.f32 %v326_v18, %v179_v22  ;;  %v391_v24 = vpop.f32.mrb[3].mxu0  ;;  %v183_v25 = vmax.f32 %v177_v20, 0.0 }
 0x130   :  { %v184_v26 = vmax.f32 %v180_v23, 0.0 }
 0x132   :  { %v185_v27 = vpack.c.bf16 %v184_v26, %v183_v25 }
 0x134   :  { %409 = vmatmul.mubr.bf16.vlgmr.msra.gmra.mrb[0].mxu1 %v185_v27 }
 0x207   :  { %v291_v29 = vpop.f32.mrb[0].mxu1 }
 0x208   :  { %v410_v30 = vpop.f32.mrb[1].mxu1  ;;  %v292_v32 = vadd.f32 %v336_v28, %v291_v29 }
 0x209   :  { %v294_v31 = vpop.f32.mrb[2].mxu1 }
 0x20a   :  { %v295_v33 = vadd.f32 %v336_v28, %v294_v31  ;;  %v411_v34 = vpop.f32.mrb[3].mxu1 }
 0x20c   :  { %v352_v35 = vpack.c.bf16 %v295_v33, %v292_v32 }
 0x20e   :  { %353 = vst [vmem:[#allocation8] sm:$0xff] %v352_v35  }
 0x20f   :  { %514 = shalt.err (!%p511_p0)
}
 0x210   :  { %s515_s12 = scalar_lea.hbm %s647_s5, 128 }
 0x211   :  { %p516_p1 = scmp.ne.s32.totalorder %s647_s5, %s515_s12  ;;  %p519_p2 = scmp.lt.u32.totalorder %s515_s12, %s647_s5 }
 0x213   :  { %p521_p3 = pnand %p519_p2, %p516_p1 }
 0x215   :  { %524 = shalt.err (!%p521_p3)
}
 0x216   :  { %319 = dma.vmem_to_hbm [thread:$0]  %s314_s10, 128, %s647_s5, [#allocation4], %s533_s30, %s533_s30, %s534_s6  }
 0x217   :  { %529 = dma.done.wait [#allocation4], 128  }
 0x218   :  { %530 = vsyncadd [#allocation4], 4294967168 }
 0x219   :  { %323 = vsyncpa [#allocation3], 1 }
 0x21a   :  { %324 = vsyncpa [#allocation6], 1 }
 0x21b   :  { %325 = vsyncpa [#allocation4], 1 }

</bundles_post_ra>
